<compile_context>
chip_gen: v6e
topology: v6e:2x2x1
jax: 0.10.0
libtpu: 0.0.40
codegen_flags: <defaults>
</compile_context>

<pallas_src>
import jax
import jax.numpy as jnp
from jax.experimental import pallas as pl
from jax.experimental.pallas import tpu as pltpu

# ---------------- problem sizes (small, consistent with the module) ----------
N = 2             # batch
C_IN = 4          # input channels
H = W = 16        # spatial
KH = KW = 3       # conv kernel
FEAT = 128        # base-model feature dim (stand-in for EfficientNetV2-S's 1280)
PROJ = 512        # projection head layer-1 output dim (classifier = Linear(512, .))
NUM_CLASSES = 2

HW = H * W                  # 256 spatial positions per sample
K_RAW = KH * KW * C_IN      # 36  (im2col contraction dim, channel-major: c*9 + kpos)
K_PAD = 128                 # contraction padded to lane width (pad fuses with bf16 cast)
OUT_PAD = 128               # classifier output padded to lane width (lane-dense store)
ROWS = N * HW               # 512 im2col rows (whole batch)
B_TOTAL = FEAT + PROJ + OUT_PAD   # 768: all biases concatenated into one operand
COMPUTE_DTYPE = jnp.bfloat16


# ---------------- fused Pallas kernel -----------------------------------------
def fused_kernel(p_ref, wc_ref, b_ref, w1_ref, w2_ref, o_ref):
    """Fused base-model stand-in + projection head + classifier (one invocation).

    p_ref : (ROWS, K_PAD)    bf16  im2col patches (whole batch), K zero-padded
    wc_ref: (K_PAD, FEAT)    bf16  flattened conv weight, K zero-padded
    b_ref : (1, B_TOTAL)     f32   [b_conv | b_proj | b_cls(padded)] concatenated
    w1_ref: (FEAT, PROJ)     bf16  projection-head weight
    w2_ref: (PROJ, OUT_PAD)  bf16  classifier weight, classes zero-padded
    o_ref : (N, OUT_PAD)     f32   logits (first NUM_CLASSES columns valid)
    """
    b_conv = b_ref[:, :FEAT]                 # (1, 128)
    b_proj = b_ref[:, FEAT:FEAT + PROJ]      # (1, 512)
    b_cls = b_ref[:, FEAT + PROJ:]           # (1, 128)

    wc = wc_ref[...]
    inv_hw = 1.0 / HW

    # Base model stand-in, chunked per sample: conv-as-matmul + bias + ReLU +
    # global average pool.  Each chunk is a (HW, FEAT) f32 intermediate (half
    # the vreg file at most) reduced immediately to one (1, FEAT) pooled row.
    feat_rows = []
    for n in range(N):  # static 2-iteration loop over 256-row sample blocks
        p = p_ref[pl.ds(n * HW, HW), :]                                   # (256, 128) bf16
        y = jnp.dot(p, wc, preferred_element_type=jnp.float32)            # (256, 128) f32
        y = jnp.maximum(y + b_conv, 0.0)                                  # bias + ReLU
        feat_rows.append(jnp.sum(y, axis=0, keepdims=True) * inv_hw)      # (1, 128) pooled
    feats = jnp.concatenate(feat_rows, axis=0)                            # (N, FEAT) f32

    # projection head: Linear + ReLU
    h = jnp.dot(feats.astype(w1_ref.dtype), w1_ref[...],
                preferred_element_type=jnp.float32) + b_proj
    h = jnp.maximum(h, 0.0)                                               # (N, PROJ) f32

    # classifier: Linear (lane-dense padded output)
    logits = jnp.dot(h.astype(w2_ref.dtype), w2_ref[...],
                     preferred_element_type=jnp.float32) + b_cls          # (N, OUT_PAD)
    o_ref[...] = logits.astype(o_ref.dtype)


# ---------------- glue ---------------------------------------------------------
def extract_patches(x_nchw):
    """3x3 'same' patches: (N, C, H, W) f32 -> (N*H*W, KH*KW*C) f32.

    Single XLA op (conv with identity filters). Output channel ordering is
    (input channel, kh, kw); the flattened stand-in conv weight uses the same
    ordering, and both the kernel path and the reference share this helper.
    """
    p = jax.lax.conv_general_dilated_patches(
        x_nchw, filter_shape=(KH, KW), window_strides=(1, 1), padding="SAME",
        dimension_numbers=("NCHW", "OIHW", "NHWC"))       # (N, H, W, K_RAW)
    return p.reshape(ROWS, K_RAW)


def prepare_params(params):
    """One-time parameter preprocessing (hoisted out of the forward pass)."""
    wc = jnp.pad(params["w_conv"], ((0, K_PAD - K_RAW), (0, 0))).astype(COMPUTE_DTYPE)
    w1 = params["w1"].astype(COMPUTE_DTYPE)
    w2 = jnp.pad(params["w2"], ((0, 0), (0, OUT_PAD - NUM_CLASSES))).astype(COMPUTE_DTYPE)
    biases = jnp.concatenate(
        [params["b_conv"],
         params["b1"],
         jnp.pad(params["b2"], ((0, 0), (0, OUT_PAD - NUM_CLASSES)))],
        axis=-1).astype(jnp.float32)                       # (1, B_TOTAL) f32
    return {"wc": wc, "w1": w1, "w2": w2, "biases": biases}


@jax.jit
def finetuned_simclr_forward(x_nchw, prep):
    """Forward pass. x_nchw: (N, C_IN, H, W) f32 -> logits (N, NUM_CLASSES)."""
    # per-call glue: one patches op + one fused pad+bf16-cast.
    patches = extract_patches(x_nchw)                                     # (512, 36) f32
    patches = jnp.pad(patches, ((0, 0), (0, K_PAD - K_RAW))).astype(COMPUTE_DTYPE)

    flops = 2 * (ROWS * K_PAD * FEAT + N * FEAT * PROJ + N * PROJ * OUT_PAD)
    bytes_accessed = (
        ROWS * K_PAD * 2 + K_PAD * FEAT * 2 + B_TOTAL * 4
        + FEAT * PROJ * 2 + PROJ * OUT_PAD * 2 + N * OUT_PAD * 4)

    vmem_spec = pl.BlockSpec(memory_space=pltpu.MemorySpace.VMEM)
    logits_pad = pl.pallas_call(
        fused_kernel,
        out_shape=jax.ShapeDtypeStruct((N, OUT_PAD), jnp.float32),
        in_specs=[vmem_spec] * 5,
        out_specs=vmem_spec,
        cost_estimate=pl.CostEstimate(
            flops=flops, transcendentals=0, bytes_accessed=bytes_accessed),
    )(patches, prep["wc"], prep["biases"], prep["w1"], prep["w2"])

    # padded columns (2..127) are exact zeros; only the sliced logits are valid.
    return logits_pad[:, :NUM_CLASSES]


# ---------------- pure-JAX reference (mirrors the kernel's bf16 rounding) ------
def reference_forward(x_nchw, params):
    def bf16(a):
        return a.astype(jnp.bfloat16).astype(jnp.float32)

    patches = bf16(extract_patches(x_nchw))                               # (512, 36)
    y = jnp.maximum(patches @ bf16(params["w_conv"]) + params["b_conv"], 0.0)
    feats = jnp.mean(y.reshape(N, HW, FEAT), axis=1)                      # (N, FEAT)
    h = jnp.maximum(bf16(feats) @ bf16(params["w1"]) + params["b1"], 0.0)
    return bf16(h) @ bf16(params["w2"]) + params["b2"]


def init_params(key):
    k = jax.random.split(key, 6)
    # stand-in conv weight directly in flattened (K_RAW, FEAT) im2col layout
    w_conv = jax.random.normal(k[0], (K_RAW, FEAT), jnp.float32) * 0.05
    b_conv = jax.random.normal(k[1], (1, FEAT), jnp.float32) * 0.01
    w1 = jax.random.normal(k[2], (FEAT, PROJ), jnp.float32) * (1.0 / FEAT ** 0.5)
    b1 = jax.random.normal(k[3], (1, PROJ), jnp.float32) * 0.01
    w2 = jax.random.normal(k[4], (PROJ, NUM_CLASSES), jnp.float32) * (1.0 / PROJ ** 0.5)
    b2 = jax.random.normal(k[5], (1, NUM_CLASSES), jnp.float32) * 0.01
    return dict(w_conv=w_conv, b_conv=b_conv, w1=w1, b1=b1, w2=w2, b2=b2)


if __name__ == "__main__":
    key = jax.random.PRNGKey(0)
    kx, kp = jax.random.split(key)
    x = jax.random.normal(kx, (N, C_IN, H, W), jnp.float32)   # PyTorch-style NCHW input
    params = init_params(kp)

    # one-time weight preprocessing (not part of the per-call forward)
    prep = prepare_params(params)
    prep = jax.tree_util.tree_map(jax.block_until_ready, prep)

    logits = finetuned_simclr_forward(x, prep)
    logits = jax.block_until_ready(logits)

    ref = reference_forward(x, params)
    assert logits.shape == (N, NUM_CLASSES), logits.shape
    assert jnp.allclose(logits, ref, atol=2e-3, rtol=2e-3), (logits, ref)

    print("KERNEL_OK")
</pallas_src>

<mosaic_0001>
module attributes {stable_mosaic.version = 11 : i64} {
  func.func @fused_kernel(%arg0: memref<512x128xbf16, #tpu.memory_space<vmem>>, %arg1: memref<128x128xbf16, #tpu.memory_space<vmem>>, %arg2: memref<1x768xf32, #tpu.memory_space<vmem>>, %arg3: memref<128x512xbf16, #tpu.memory_space<vmem>>, %arg4: memref<512x128xbf16, #tpu.memory_space<vmem>>, %arg5: memref<2x128xf32, #tpu.memory_space<vmem>>) attributes {dimension_semantics = [], scalar_prefetch = 0 : i64, scratch_operands = 0 : i64, tpu.core_type = #tpu.core_type<tc>} {
    %c0 = arith.constant 0 : index
    %c0_0 = arith.constant 0 : index
    %0 = vector.load %arg2[%c0, %c0_0] : memref<1x768xf32, #tpu.memory_space<vmem>>, vector<1x128xf32>
    %c0_1 = arith.constant 0 : index
    %c128 = arith.constant 128 : index
    %1 = vector.load %arg2[%c0_1, %c128] : memref<1x768xf32, #tpu.memory_space<vmem>>, vector<1x512xf32>
    %c0_2 = arith.constant 0 : index
    %c640 = arith.constant 640 : index
    %2 = vector.load %arg2[%c0_2, %c640] : memref<1x768xf32, #tpu.memory_space<vmem>>, vector<1x128xf32>
    %c0_3 = arith.constant 0 : index
    %c0_4 = arith.constant 0 : index
    %3 = vector.load %arg1[%c0_3, %c0_4] : memref<128x128xbf16, #tpu.memory_space<vmem>>, vector<128x128xbf16>
    %c0_5 = arith.constant 0 : index
    %c0_6 = arith.constant 0 : index
    %4 = vector.load %arg0[%c0_5, %c0_6] : memref<512x128xbf16, #tpu.memory_space<vmem>>, vector<256x128xbf16>
    %cst = arith.constant dense<0.000000e+00> : vector<256x128xf32>
    %5 = tpu.matmul %4, %3, %cst {dimension_numbers = #tpu.dot_dimension_numbers<[1], [0], [0], [1], [0, 0, 1, 1], [], []>} : vector<256x128xbf16>, vector<128x128xbf16>, vector<256x128xf32> -> vector<256x128xf32>
    %6 = vector.broadcast %0 : vector<1x128xf32> to vector<256x128xf32>
    %7 = arith.addf %5, %6 : vector<256x128xf32>
    %cst_7 = arith.constant 0.000000e+00 : f32
    %8 = vector.broadcast %cst_7 : f32 to vector<256x128xf32>
    %9 = arith.maximumf %7, %8 : vector<256x128xf32>
    %cst_8 = arith.constant dense<0.000000e+00> : vector<128xf32>
    %10 = vector.multi_reduction <add>, %9, %cst_8 [0] : vector<256x128xf32> to vector<128xf32>
    %11 = vector.shape_cast %10 : vector<128xf32> to vector<1x128xf32>
    %cst_9 = arith.constant 3.906250e-03 : f32
    %12 = vector.broadcast %cst_9 : f32 to vector<1x128xf32>
    %13 = arith.mulf %11, %12 : vector<1x128xf32>
    %c256 = arith.constant 256 : index
    %c0_10 = arith.constant 0 : index
    %14 = vector.load %arg0[%c256, %c0_10] : memref<512x128xbf16, #tpu.memory_space<vmem>>, vector<256x128xbf16>
    %cst_11 = arith.constant dense<0.000000e+00> : vector<256x128xf32>
    %15 = tpu.matmul %14, %3, %cst_11 {dimension_numbers = #tpu.dot_dimension_numbers<[1], [0], [0], [1], [0, 0, 1, 1], [], []>} : vector<256x128xbf16>, vector<128x128xbf16>, vector<256x128xf32> -> vector<256x128xf32>
    %16 = vector.broadcast %0 : vector<1x128xf32> to vector<256x128xf32>
    %17 = arith.addf %15, %16 : vector<256x128xf32>
    %cst_12 = arith.constant 0.000000e+00 : f32
    %18 = vector.broadcast %cst_12 : f32 to vector<256x128xf32>
    %19 = arith.maximumf %17, %18 : vector<256x128xf32>
    %cst_13 = arith.constant dense<0.000000e+00> : vector<128xf32>
    %20 = vector.multi_reduction <add>, %19, %cst_13 [0] : vector<256x128xf32> to vector<128xf32>
    %21 = vector.shape_cast %20 : vector<128xf32> to vector<1x128xf32>
    %cst_14 = arith.constant 3.906250e-03 : f32
    %22 = vector.broadcast %cst_14 : f32 to vector<1x128xf32>
    %23 = arith.mulf %21, %22 : vector<1x128xf32>
    %24 = tpu.concatenate %13, %23 in 0 : vector<1x128xf32>, vector<1x128xf32> -> vector<2x128xf32>
    %25 = arith.truncf %24 : vector<2x128xf32> to vector<2x128xbf16>
    %c0_15 = arith.constant 0 : index
    %c0_16 = arith.constant 0 : index
    %26 = vector.load %arg3[%c0_15, %c0_16] : memref<128x512xbf16, #tpu.memory_space<vmem>>, vector<128x512xbf16>
    %cst_17 = arith.constant dense<0.000000e+00> : vector<2x512xf32>
    %27 = tpu.matmul %25, %26, %cst_17 {dimension_numbers = #tpu.dot_dimension_numbers<[1], [0], [0], [1], [0, 0, 1, 1], [], []>} : vector<2x128xbf16>, vector<128x512xbf16>, vector<2x512xf32> -> vector<2x512xf32>
    %28 = vector.broadcast %1 : vector<1x512xf32> to vector<2x512xf32>
    %29 = arith.addf %27, %28 : vector<2x512xf32>
    %cst_18 = arith.constant 0.000000e+00 : f32
    %30 = vector.broadcast %cst_18 : f32 to vector<2x512xf32>
    %31 = arith.maximumf %29, %30 : vector<2x512xf32>
    %32 = arith.truncf %31 : vector<2x512xf32> to vector<2x512xbf16>
    %c0_19 = arith.constant 0 : index
    %c0_20 = arith.constant 0 : index
    %33 = vector.load %arg4[%c0_19, %c0_20] : memref<512x128xbf16, #tpu.memory_space<vmem>>, vector<512x128xbf16>
    %cst_21 = arith.constant dense<0.000000e+00> : vector<2x128xf32>
    %34 = tpu.matmul %32, %33, %cst_21 {dimension_numbers = #tpu.dot_dimension_numbers<[1], [0], [0], [1], [0, 0, 1, 1], [], []>} : vector<2x512xbf16>, vector<512x128xbf16>, vector<2x128xf32> -> vector<2x128xf32>
    %35 = vector.broadcast %2 : vector<1x128xf32> to vector<2x128xf32>
    %36 = arith.addf %34, %35 : vector<2x128xf32>
    %c0_22 = arith.constant 0 : index
    %c0_23 = arith.constant 0 : index
    %37 = vector.load %arg5[%c0_22, %c0_23] : memref<2x128xf32, #tpu.memory_space<vmem>>, vector<2x128xf32>
    tpu.vector_store %arg5[%c0_22, %c0_23], %36 {strides = array<i32>} : memref<2x128xf32, #tpu.memory_space<vmem>>, vector<2x128xf32>,
    return
  }
}

</mosaic_0001>

<bundles_post_ra>
// kernel: finetuned_simclr_forward.1
= control target key start
LH: loop header
LB: loop body
LE: loop exit
PB: predicated region body
PF: predicated region fallthrough
CT: control target
= control target key end

     0   :  { %s2336_s0 = inlined_call_operand.vmem [shape: bf16[512,128], index: 0, kind: input, shape index: {}]   ;;  %s2337_s1 = inlined_call_operand.vmem [shape: bf16[128,128], index: 1, kind: input, shape index: {}]   ;;  %s2338_s2 = inlined_call_operand.vmem [shape: f32[1,768], index: 2, kind: input, shape index: {}]   ;;  %s2339_s3 = inlined_call_operand.vmem [shape: bf16[128,512], index: 3, kind: input, shape index: {}]   ;;  %s2340_s4 = inlined_call_operand.vmem [shape: bf16[512,128], index: 4, kind: input, shape index: {}]   ;;  %s2341_s5 = inlined_call_operand.hbm [shape: f32[2,128], index: 5, kind: output, shape index: {}]  }
   0x1   :  { %v1772_v0 = vld [vmem:[%s2337_s1 + $0x38] sm:$0xff]   ;;  %v1773_v1 = vld [vmem:[%s2337_s1 + $0x30] sm:$0xff]   ;;  %v1774_v2 = vld [vmem:[%s2337_s1 + $0x28] sm:$0xff]  }
   0x2   :  { %1674 = vmatprep.subr.bf16.mxu0 %v1772_v0  ;;  %1722 = vmatprep.subr.bf16.mxu1 %v1772_v0  ;;  %v1775_v3 = vld [vmem:[%s2337_s1 + $0x20] sm:$0xff]   ;;  %v1776_v6 = vld [vmem:[%s2337_s1 + $0x18] sm:$0xff]   ;;  %v1777_v7 = vld [vmem:[%s2337_s1 + $0x10] sm:$0xff]  }
   0x3   :  { %1675 = vmatpush3.bf16.msra.mxu0 %v1772_v0  ;;  %1723 = vmatpush3.bf16.msra.mxu1 %v1772_v0  ;;  %v1780_v4 = vld [vmem:[%s2336_s0] sm:$0xff]   ;;  %v1778_v8 = vld [vmem:[%s2337_s1 + $0x8] sm:$0xff]   ;;  %v1784_v12 = vld [vmem:[%s2336_s0 + $0x10] sm:$0xff]  }
   0x4   :  { %1676 = vmatprep.subr.bf16.mxu0 %v1773_v1  ;;  %1724 = vmatprep.subr.bf16.mxu1 %v1773_v1  ;;  %v1781_v5 = vld [vmem:[%s2336_s0 + $0x80] sm:$0xff]   ;;  %v1782_v10 = vld [vmem:[%s2336_s0 + $0x8] sm:$0xff]   ;;  %v1785_v13 = vld [vmem:[%s2336_s0 + $0x90] sm:$0xff]  }
   0x5   :  { %1690 = vmatprep.mubr.bf16.mxu0 %v1780_v4  ;;  %1738 = vmatprep.mubr.bf16.mxu1 %v1781_v5  ;;  %v1779_v9 = vld [vmem:[%s2337_s1] sm:$0xff]   ;;  %v1783_v11 = vld [vmem:[%s2336_s0 + $0x88] sm:$0xff]   ;;  %v1786_v14 = vld [vmem:[%s2336_s0 + $0x18] sm:$0xff]  }
   0x6   :  { %v1787_v15 = vld [vmem:[%s2336_s0 + $0x98] sm:$0xff]   ;;  %v1788_v16 = vld [vmem:[%s2336_s0 + $0x20] sm:$0xff]   ;;  %v1790_v18 = vld [vmem:[%s2336_s0 + $0x28] sm:$0xff]  }
   0x7   :  { %1677 = vmatpush3.bf16.msra.mxu0 %v1773_v1  ;;  %1725 = vmatpush3.bf16.msra.mxu1 %v1773_v1  ;;  %v1789_v17 = vld [vmem:[%s2336_s0 + $0xa0] sm:$0xff]   ;;  %v1791_v19 = vld [vmem:[%s2336_s0 + $0xa8] sm:$0xff]   ;;  %v1792_v20 = vld [vmem:[%s2336_s0 + $0x30] sm:$0xff]  }
   0x8   :  { %1678 = vmatprep.subr.bf16.mxu0 %v1774_v2  ;;  %1726 = vmatprep.subr.bf16.mxu1 %v1774_v2  ;;  %v1793_v21 = vld [vmem:[%s2336_s0 + $0xb0] sm:$0xff]   ;;  %v1794_v22 = vld [vmem:[%s2336_s0 + $0x38] sm:$0xff]   ;;  %v1796_v24 = vld [vmem:[%s2336_s0 + $0x40] sm:$0xff]  }
   0x9   :  { %v1795_v23 = vld [vmem:[%s2336_s0 + $0xb8] sm:$0xff]   ;;  %v1797_v25 = vld [vmem:[%s2336_s0 + $0xc0] sm:$0xff]   ;;  %v1798_v26 = vld [vmem:[%s2336_s0 + $0x48] sm:$0xff]  }
   0xa   :  { %v1799_v27 = vld [vmem:[%s2336_s0 + $0xc8] sm:$0xff]   ;;  %v1800_v28 = vld [vmem:[%s2336_s0 + $0x50] sm:$0xff]   ;;  %v1802_v30 = vld [vmem:[%s2336_s0 + $0x58] sm:$0xff]  }
   0xb   :  { %1679 = vmatpush3.bf16.msra.mxu0 %v1774_v2  ;;  %1727 = vmatpush3.bf16.msra.mxu1 %v1774_v2  ;;  %v1801_v29 = vld [vmem:[%s2336_s0 + $0xd0] sm:$0xff]   ;;  %v1803_v31 = vld [vmem:[%s2336_s0 + $0xd8] sm:$0xff]   ;;  %v1804_v32 = vld [vmem:[%s2336_s0 + $0x60] sm:$0xff]  }
   0xc   :  { %1680 = vmatprep.subr.bf16.mxu0 %v1775_v3  ;;  %1728 = vmatprep.subr.bf16.mxu1 %v1775_v3  ;;  %v1805_v33 = vld [vmem:[%s2336_s0 + $0xe0] sm:$0xff]  }
   0xf   :  { %1681 = vmatpush3.bf16.msra.mxu0 %v1775_v3  ;;  %1729 = vmatpush3.bf16.msra.mxu1 %v1775_v3 }
  0x10   :  { %1682 = vmatprep.subr.bf16.mxu0 %v1776_v6  ;;  %1730 = vmatprep.subr.bf16.mxu1 %v1776_v6 }
  0x13   :  { %1683 = vmatpush3.bf16.msra.mxu0 %v1776_v6  ;;  %1731 = vmatpush3.bf16.msra.mxu1 %v1776_v6 }
  0x14   :  { %1684 = vmatprep.subr.bf16.mxu0 %v1777_v7  ;;  %1732 = vmatprep.subr.bf16.mxu1 %v1777_v7 }
  0x17   :  { %1685 = vmatpush3.bf16.msra.mxu0 %v1777_v7  ;;  %1733 = vmatpush3.bf16.msra.mxu1 %v1777_v7 }
  0x18   :  { %1686 = vmatprep.subr.bf16.mxu0 %v1778_v8  ;;  %1734 = vmatprep.subr.bf16.mxu1 %v1778_v8 }
  0x1b   :  { %1687 = vmatpush3.bf16.msra.mxu0 %v1778_v8  ;;  %1735 = vmatpush3.bf16.msra.mxu1 %v1778_v8 }
  0x1c   :  { %1688 = vmatprep.subr.bf16.mxu0 %v1779_v9  ;;  %1736 = vmatprep.subr.bf16.mxu1 %v1779_v9 }
  0x1f   :  { %1689 = vmatpush3.bf16.msra.mxu0 %v1779_v9  ;;  %1737 = vmatpush3.bf16.msra.mxu1 %v1779_v9 }
  0x22   :  { %1691 = vmatmul.mubr.bf16.vlgmr.msra.gmra.mxu0 %v1782_v10  ;;  %1739 = vmatmul.mubr.bf16.vlgmr.msra.gmra.mxu1 %v1783_v11 }
  0x23   :  { %1694 = vmatprep.mubr.bf16.mxu0 %v1784_v12  ;;  %1742 = vmatprep.mubr.bf16.mxu1 %v1785_v13 }
  0x2a   :  { %1695 = vmatmul.mubr.bf16.gmra.mxu0 %v1786_v14  ;;  %1743 = vmatmul.mubr.bf16.gmra.mxu1 %v1787_v15 }
  0x2b   :  { %1698 = vmatprep.mubr.bf16.mxu0 %v1788_v16  ;;  %1746 = vmatprep.mubr.bf16.mxu1 %v1789_v17 }
  0x32   :  { %1699 = vmatmul.mubr.bf16.gmra.mxu0 %v1790_v18  ;;  %1747 = vmatmul.mubr.bf16.gmra.mxu1 %v1791_v19 }
  0x33   :  { %1702 = vmatprep.mubr.bf16.mxu0 %v1792_v20  ;;  %1750 = vmatprep.mubr.bf16.mxu1 %v1793_v21 }
  0x3a   :  { %1703 = vmatmul.mubr.bf16.gmra.mxu0 %v1794_v22  ;;  %1751 = vmatmul.mubr.bf16.gmra.mxu1 %v1795_v23 }
  0x3b   :  { %1706 = vmatprep.mubr.bf16.mxu0 %v1796_v24  ;;  %1754 = vmatprep.mubr.bf16.mxu1 %v1797_v25 }
  0x42   :  { %1707 = vmatmul.mubr.bf16.gmra.mxu0 %v1798_v26  ;;  %1755 = vmatmul.mubr.bf16.gmra.mxu1 %v1799_v27 }
  0x43   :  { %1710 = vmatprep.mubr.bf16.mxu0 %v1800_v28  ;;  %1758 = vmatprep.mubr.bf16.mxu1 %v1801_v29 }
  0x44   :  { %10 = vsyncpa [#allocation3], 0  ;;  %v1806_v34 = vld [vmem:[%s2336_s0 + $0x68] sm:$0xff]   ;;  %v1808_v36 = vld [vmem:[%s2336_s0 + $0x70] sm:$0xff]   ;;  %v1914_v8 = vmov 0   ;;  %vm813_vm0 = vcmask 1040384  }
  0x45   :  { %v1807_v35 = vld [vmem:[%s2336_s0 + $0xe8] sm:$0xff]   ;;  %v1809_v37 = vld [vmem:[%s2336_s0 + $0xf0] sm:$0xff]   ;;  %v1810_v38 = vld [vmem:[%s2336_s0 + $0x78] sm:$0xff]   ;;  %s1915_s16 = smov [#allocation2]  }
  0x46   :  { %v1811_v39 = vld [vmem:[%s2336_s0 + $0xf8] sm:$0xff]   ;;  %v1812_v40 = vld [vmem:[%s2339_s3 + $0xe0] ss:$16 sps:$4 sm:$0xff]   ;;  %v1814_v41 = vld [vmem:[%s2339_s3 + $0xe4] ss:$16 sps:$4 sm:$0xff]   ;;  %s1468_s17 = sshll.u32 %s1915_s16, 4  ;;  %s1469_s17 = int_to_ptr.vmem [resolvable:$true] %s1468_s17 }
  0x47   :  { %1029 = vmatprep.subr.bf16.mxu0 %v1814_v41  ;;  %v1815_v42 = vld [vmem:[%s2339_s3 + $0xe8] ss:$16 sps:$4 sm:$0xff]   ;;  %v1817_v43 = vld [vmem:[%s2339_s3 + $0xec] ss:$16 sps:$4 sm:$0xff]   ;;  %v1818_v44 = vld [vmem:[%s2339_s3 + $0xc0] ss:$16 sps:$4 sm:$0xff]   ;;  %p1897_p1 = scmp.lt.s32.totalorder %s1469_s17, %s1469_s17 }
  0x48   :  { %1030 = vmatpush1.bf16.msra.mxu0 %v1812_v40  ;;  %1070 = vmatprep.subr.bf16.mxu1 %v1817_v43  ;;  %v1820_v45 = vld [vmem:[%s2339_s3 + $0xc4] ss:$16 sps:$4 sm:$0xff]   ;;  %v1821_v46 = vld [vmem:[%s2339_s3 + $0xc8] ss:$16 sps:$4 sm:$0xff]   ;;  %v1823_v47 = vld [vmem:[%s2339_s3 + $0xcc] ss:$16 sps:$4 sm:$0xff]  }
  0x49   :  { %1071 = vmatpush1.bf16.msra.mxu1 %v1815_v42  ;;  %1031 = vmatprep.subr.bf16.mxu0 %v1820_v45  ;;  %v1824_v48 = vld [vmem:[%s2339_s3 + $0xa0] ss:$16 sps:$4 sm:$0xff]   ;;  %v1826_v49 = vld [vmem:[%s2339_s3 + $0xa4] ss:$16 sps:$4 sm:$0xff]   ;;  %v1827_v50 = vld [vmem:[%s2339_s3 + $0xa8] ss:$16 sps:$4 sm:$0xff]  }
  0x4a   :  { %1711 = vmatmul.mubr.bf16.gmra.mxu0 %v1802_v30  ;;  %1759 = vmatmul.mubr.bf16.gmra.mxu1 %v1803_v31  ;;  %v1829_v51 = vld [vmem:[%s2339_s3 + $0xac] ss:$16 sps:$4 sm:$0xff]   ;;  %v1830_v52 = vld [vmem:[%s2339_s3 + $0x80] ss:$16 sps:$4 sm:$0xff]   ;;  %v1832_v53 = vld [vmem:[%s2339_s3 + $0x84] ss:$16 sps:$4 sm:$0xff]  }
  0x4b   :  { %1714 = vmatprep.mubr.bf16.mxu0 %v1804_v32  ;;  %1762 = vmatprep.mubr.bf16.mxu1 %v1805_v33  ;;  %v1833_v54 = vld [vmem:[%s2339_s3 + $0x88] ss:$16 sps:$4 sm:$0xff]   ;;  %v1835_v55 = vld [vmem:[%s2339_s3 + $0x8c] ss:$16 sps:$4 sm:$0xff]   ;;  %v1836_v56 = vld [vmem:[%s2339_s3 + $0x60] ss:$16 sps:$4 sm:$0xff]  }
  0x4c   :  { %1032 = vmatpush1.bf16.msra.mxu0 %v1818_v44  ;;  %1072 = vmatprep.subr.bf16.mxu1 %v1823_v47  ;;  %v1838_v57 = vld [vmem:[%s2339_s3 + $0x64] ss:$16 sps:$4 sm:$0xff]   ;;  %v1839_v58 = vld [vmem:[%s2339_s3 + $0x68] ss:$16 sps:$4 sm:$0xff]   ;;  %v1841_v59 = vld [vmem:[%s2339_s3 + $0x6c] ss:$16 sps:$4 sm:$0xff]  }
  0x4d   :  { %1073 = vmatpush1.bf16.msra.mxu1 %v1821_v46  ;;  %1033 = vmatprep.subr.bf16.mxu0 %v1826_v49  ;;  %v1844_v60 = vld [vmem:[%s2339_s3 + $0x44] ss:$16 sps:$4 sm:$0xff]   ;;  %v1847_v61 = vld [vmem:[%s2339_s3 + $0x4c] ss:$16 sps:$4 sm:$0xff]   ;;  %v1842_v62 = vld [vmem:[%s2339_s3 + $0x40] ss:$16 sps:$4 sm:$0xff]  }
  0x4e   :  { %1074 = vmatprep.subr.bf16.mxu1 %v1829_v51  ;;  %v1845_v63 = vld [vmem:[%s2339_s3 + $0x48] ss:$16 sps:$4 sm:$0xff]   ;;  %v1850_v0 = vld [vmem:[%s2339_s3 + $0x24] ss:$16 sps:$4 sm:$0xff]   ;;  %v1853_v1 = vld [vmem:[%s2339_s3 + $0x2c] ss:$16 sps:$4 sm:$0xff]  }
  0x4f   :  { %v1848_v2 = vld [vmem:[%s2339_s3 + $0x20] ss:$16 sps:$4 sm:$0xff]   ;;  %v1851_v3 = vld [vmem:[%s2339_s3 + $0x28] ss:$16 sps:$4 sm:$0xff]   ;;  %v1856_v4 = vld [vmem:[%s2339_s3 + $0x4] ss:$16 sps:$4 sm:$0xff]  }
  0x50   :  { %1034 = vmatpush1.bf16.msra.mxu0 %v1824_v48  ;;  %v1859_v5 = vld [vmem:[%s2339_s3 + $0xc] ss:$16 sps:$4 sm:$0xff]   ;;  %v1854_v6 = vld [vmem:[%s2339_s3] ss:$16 sps:$4 sm:$0xff]   ;;  %v1857_v7 = vld [vmem:[%s2339_s3 + $0x8] ss:$16 sps:$4 sm:$0xff]  }
  0x51   :  { %1075 = vmatpush1.bf16.msra.mxu1 %v1827_v50  ;;  %1035 = vmatprep.subr.bf16.mxu0 %v1832_v53  ;;  %v1860_v9 = vld [vmem:[%s2340_s4 + $0x78] sm:$0xff]   ;;  %v2171_v15 = vld [vmem:[%s2338_s2] ss:$0 sm:$0xff]  ;;  %s1892_s18 = scalar_lea.vmem %s1469_s17, 32 }
  0x52   :  { %1715 = vmatmul.mubr.bf16.gmra.mxu0 %v1806_v34  ;;  %1763 = vmatmul.mubr.bf16.gmra.mxu1 %v1807_v35  ;;  %v1861_v10 = vld [vmem:[%s2340_s4 + $0xf8] sm:$0xff]   ;;  %p1893_p0 = scmp.ne.s32.totalorder %s1469_s17, %s1892_s18  ;;  %p1898_p2 = scmp.lt.s32.totalorder %s1892_s18, %s1892_s18 }
  0x53   :  { %1718 = vmatprep.mubr.bf16.mxu0 %v1808_v36  ;;  %1766 = vmatprep.mubr.bf16.mxu1 %v1809_v37 }
  0x54   :  { %1036 = vmatpush1.bf16.msra.mxu0 %v1830_v52  ;;  %1076 = vmatprep.subr.bf16.mxu1 %v1835_v55  ;;  %p1899_p3 = por %p1898_p2, %p1897_p1 }
  0x55   :  { %1077 = vmatpush1.bf16.msra.mxu1 %v1833_v54  ;;  %1037 = vmatprep.subr.bf16.mxu0 %v1838_v57 }
  0x56   :  { %1078 = vmatprep.subr.bf16.mxu1 %v1841_v59  ;;  %p1900_p4 = pnand %p1899_p3, %p1893_p0 }
  0x58   :  { %1038 = vmatpush1.bf16.msra.mxu0 %v1836_v56 }
  0x59   :  { %1079 = vmatpush1.bf16.msra.mxu1 %v1839_v58  ;;  %1039 = vmatprep.subr.bf16.mxu0 %v1844_v60 }
  0x5a   :  { %1719 = vmatmul.mubr.bf16.gmra.mxu0 %v1810_v38  ;;  %1767 = vmatmul.mubr.bf16.gmra.mxu1 %v1811_v39 }
  0x5b   :  { %1080 = vmatprep.subr.bf16.mxu1 %v1847_v61  ;;  %1061 = vmatprep.mubr.bf16.mxu0 %v1914_v8 }
  0x5c   :  { %1040 = vmatpush1.bf16.msra.mxu0 %v1842_v62  ;;  %1102 = vmatprep.mubr.bf16.mxu1 %v1914_v8 }
  0x5d   :  { %1081 = vmatpush1.bf16.msra.mxu1 %v1845_v63  ;;  %1041 = vmatprep.subr.bf16.mxu0 %v1850_v0 }
  0x5e   :  { %1082 = vmatprep.subr.bf16.mxu1 %v1853_v1 }
  0x60   :  { %1042 = vmatpush1.bf16.msra.mxu0 %v1848_v2 }
  0x61   :  { %1083 = vmatpush1.bf16.msra.mxu1 %v1851_v3  ;;  %1043 = vmatprep.subr.bf16.mxu0 %v1856_v4 }
  0x62   :  { %1084 = vmatprep.subr.bf16.mxu1 %v1859_v5 }
  0x64   :  { %1044 = vmatpush1.bf16.msra.mxu0 %v1854_v6 }
  0x65   :  { %1085 = vmatpush1.bf16.msra.mxu1 %v1857_v7  ;;  %1630 = vmatprep.subr.bf16.mxu0 %v1860_v9 }
  0x66   :  { %1652 = vmatprep.subr.bf16.mxu1 %v1861_v10 }
  0xe2   :  { %v1692_v11 = vpop.f32.mrf.mxu0  ;;  %v1740_v12 = vpop.f32.mrf.mxu1 }
  0xe3   :  { %v266_v22 = vadd.f32 %v1692_v11, %v2171_v15  ;;  %v625_v23 = vadd.f32 %v1740_v12, %v2171_v15 }
  0xe4   :  { %v257_v13 = vpop.f32.mrf.mxu0  ;;  %v616_v14 = vpop.f32.mrf.mxu1 }
  0xe5   :  { %v258_v16 = vadd.f32 %v2171_v15, %v257_v13  ;;  %v617_v17 = vadd.f32 %v2171_v15, %v616_v14  ;;  %v386_v36 = vmax.f32 %v266_v22, 0.0  ;;  %v745_v37 = vmax.f32 %v625_v23, 0.0 }
  0xe6   :  { %v1693_v18 = vpop.f32.mrf.mxu0  ;;  %v1741_v19 = vpop.f32.mrf.mxu1 }
  0xe7   :  { %v384_v26 = vmax.f32 %v258_v16, 0.0  ;;  %v743_v27 = vmax.f32 %v617_v17, 0.0  ;;  %v269_v30 = vadd.f32 %v1693_v18, %v2171_v15  ;;  %v628_v31 = vadd.f32 %v1741_v19, %v2171_v15 }
  0xe8   :  { %v260_v20 = vpop.f32.mrf.mxu0  ;;  %v619_v21 = vpop.f32.mrf.mxu1 }
  0xe9   :  { %v261_v24 = vadd.f32 %v2171_v15, %v260_v20  ;;  %v620_v25 = vadd.f32 %v2171_v15, %v619_v21  ;;  %v387_v44 = vmax.f32 %v269_v30, 0.0  ;;  %v746_v45 = vmax.f32 %v628_v31, 0.0 }
  0xea   :  { %v1696_v28 = vpop.f32.mrf.mxu0  ;;  %v1744_v29 = vpop.f32.mrf.mxu1 }
  0xeb   :  { %v385_v32 = vmax.f32 %v261_v24, 0.0  ;;  %v744_v33 = vmax.f32 %v620_v25, 0.0  ;;  %v282_v48 = vadd.f32 %v1696_v28, %v2171_v15  ;;  %v641_v49 = vadd.f32 %v1744_v29, %v2171_v15 }
  0xec   :  { %v273_v34 = vpop.f32.mrf.mxu0  ;;  %v632_v35 = vpop.f32.mrf.mxu1 }
  0xed   :  { %v416_v38 = vadd.f32 %v385_v32, %v384_v26  ;;  %v775_v39 = vadd.f32 %v744_v33, %v743_v27  ;;  %v274_v40 = vadd.f32 %v2171_v15, %v273_v34  ;;  %v633_v41 = vadd.f32 %v2171_v15, %v632_v35 }
  0xee   :  { %v1697_v42 = vpop.f32.mrf.mxu0  ;;  %v1745_v43 = vpop.f32.mrf.mxu1  ;;  %v390_v4 = vmax.f32 %v282_v48, 0.0  ;;  %v749_v5 = vmax.f32 %v641_v49, 0.0 }
  0xef   :  { %v417_v46 = vadd.f32 %v416_v38, %v386_v36  ;;  %v776_v47 = vadd.f32 %v775_v39, %v745_v37  ;;  %v388_v52 = vmax.f32 %v274_v40, 0.0  ;;  %v747_v54 = vmax.f32 %v633_v41, 0.0 }
  0xf0   :  { %v276_v50 = vpop.f32.mrf.mxu0  ;;  %v635_v51 = vpop.f32.mrf.mxu1  ;;  %v285_v62 = vadd.f32 %v1697_v42, %v2171_v15  ;;  %v644_v63 = vadd.f32 %v1745_v43, %v2171_v15 }
  0xf1   :  { %v418_v53 = vadd.f32 %v417_v46, %v387_v44  ;;  %v777_v55 = vadd.f32 %v776_v47, %v746_v45  ;;  %v277_v56 = vadd.f32 %v2171_v15, %v276_v50  ;;  %v636_v57 = vadd.f32 %v2171_v15, %v635_v51 }
  0xf2   :  { %v1700_v58 = vpop.f32.mrf.mxu0  ;;  %v1748_v59 = vpop.f32.mrf.mxu1  ;;  %v391_v12 = vmax.f32 %v285_v62, 0.0  ;;  %v750_v13 = vmax.f32 %v644_v63, 0.0 }
  0xf3   :  { %v419_v60 = vadd.f32 %v418_v53, %v388_v52  ;;  %v778_v61 = vadd.f32 %v777_v55, %v747_v54  ;;  %v389_v0 = vmax.f32 %v277_v56, 0.0  ;;  %v748_v1 = vmax.f32 %v636_v57, 0.0 }
  0xf4   :  { %v289_v2 = vpop.f32.mrf.mxu0  ;;  %v648_v3 = vpop.f32.mrf.mxu1  ;;  %v298_v19 = vadd.f32 %v1700_v58, %v2171_v15  ;;  %v657_v20 = vadd.f32 %v1748_v59, %v2171_v15 }
  0xf5   :  { %v420_v6 = vadd.f32 %v419_v60, %v389_v0  ;;  %v779_v7 = vadd.f32 %v778_v61, %v748_v1  ;;  %v290_v8 = vadd.f32 %v2171_v15, %v289_v2  ;;  %v649_v9 = vadd.f32 %v2171_v15, %v648_v3 }
  0xf6   :  { %v1701_v10 = vpop.f32.mrf.mxu0  ;;  %v1749_v11 = vpop.f32.mrf.mxu1  ;;  %v394_v37 = vmax.f32 %v298_v19, 0.0  ;;  %v753_v38 = vmax.f32 %v657_v20, 0.0 }
  0xf7   :  { %v421_v14 = vadd.f32 %v420_v6, %v390_v4  ;;  %v780_v16 = vadd.f32 %v779_v7, %v749_v5  ;;  %v392_v23 = vmax.f32 %v290_v8, 0.0  ;;  %v751_v25 = vmax.f32 %v649_v9, 0.0 }
  0xf8   :  { %v292_v17 = vpop.f32.mrf.mxu0  ;;  %v651_v18 = vpop.f32.mrf.mxu1  ;;  %v301_v33 = vadd.f32 %v1701_v10, %v2171_v15  ;;  %v660_v34 = vadd.f32 %v1749_v11, %v2171_v15 }
  0xf9   :  { %v293_v21 = vadd.f32 %v2171_v15, %v292_v17  ;;  %v652_v22 = vadd.f32 %v2171_v15, %v651_v18  ;;  %v422_v24 = vadd.f32 %v421_v14, %v391_v12  ;;  %v781_v26 = vadd.f32 %v780_v16, %v750_v13 }
  0xfa   :  { %v1704_v27 = vpop.f32.mrf.mxu0  ;;  %v1752_v28 = vpop.f32.mrf.mxu1  ;;  %v395_v45 = vmax.f32 %v301_v33, 0.0  ;;  %v754_v46 = vmax.f32 %v660_v34, 0.0 }
  0xfb   :  { %v393_v29 = vmax.f32 %v293_v21, 0.0  ;;  %v752_v30 = vmax.f32 %v652_v22, 0.0  ;;  %v423_v31 = vadd.f32 %v422_v24, %v392_v23  ;;  %v782_v32 = vadd.f32 %v781_v26, %v751_v25 }
  0xfc   :  { %v305_v35 = vpop.f32.mrf.mxu0  ;;  %v664_v36 = vpop.f32.mrf.mxu1  ;;  %v314_v51 = vadd.f32 %v1704_v27, %v2171_v15  ;;  %v673_v52 = vadd.f32 %v1752_v28, %v2171_v15 }
  0xfd   :  { %v424_v39 = vadd.f32 %v423_v31, %v393_v29  ;;  %v783_v40 = vadd.f32 %v782_v32, %v752_v30  ;;  %v306_v41 = vadd.f32 %v2171_v15, %v305_v35  ;;  %v665_v42 = vadd.f32 %v2171_v15, %v664_v36 }
  0xfe   :  { %v1705_v43 = vpop.f32.mrf.mxu0  ;;  %v1753_v44 = vpop.f32.mrf.mxu1  ;;  %v398_v5 = vmax.f32 %v314_v51, 0.0  ;;  %v757_v6 = vmax.f32 %v673_v52, 0.0 }
  0xff   :  { %v425_v47 = vadd.f32 %v424_v39, %v394_v37  ;;  %v784_v48 = vadd.f32 %v783_v40, %v753_v38  ;;  %v396_v55 = vmax.f32 %v306_v41, 0.0  ;;  %v755_v57 = vmax.f32 %v665_v42, 0.0 }
 0x100   :  { %v308_v49 = vpop.f32.mrf.mxu0  ;;  %v667_v50 = vpop.f32.mrf.mxu1  ;;  %v317_v1 = vadd.f32 %v1705_v43, %v2171_v15  ;;  %v676_v2 = vadd.f32 %v1753_v44, %v2171_v15 }
 0x101   :  { %v309_v53 = vadd.f32 %v2171_v15, %v308_v49  ;;  %v668_v54 = vadd.f32 %v2171_v15, %v667_v50  ;;  %v426_v56 = vadd.f32 %v425_v47, %v395_v45  ;;  %v785_v58 = vadd.f32 %v784_v48, %v754_v46 }
 0x102   :  { %v1708_v59 = vpop.f32.mrf.mxu0  ;;  %v1756_v60 = vpop.f32.mrf.mxu1  ;;  %v399_v13 = vmax.f32 %v317_v1, 0.0  ;;  %v758_v14 = vmax.f32 %v676_v2, 0.0 }
 0x103   :  { %v397_v61 = vmax.f32 %v309_v53, 0.0  ;;  %v756_v62 = vmax.f32 %v668_v54, 0.0  ;;  %v427_v63 = vadd.f32 %v426_v56, %v396_v55  ;;  %v786_v0 = vadd.f32 %v785_v58, %v755_v57 }
 0x104   :  { %v321_v3 = vpop.f32.mrf.mxu0  ;;  %v680_v4 = vpop.f32.mrf.mxu1  ;;  %v330_v20 = vadd.f32 %v1708_v59, %v2171_v15  ;;  %v689_v21 = vadd.f32 %v1756_v60, %v2171_v15 }
 0x105   :  { %v428_v7 = vadd.f32 %v427_v63, %v397_v61  ;;  %v787_v8 = vadd.f32 %v786_v0, %v756_v62  ;;  %v322_v9 = vadd.f32 %v2171_v15, %v321_v3  ;;  %v681_v10 = vadd.f32 %v2171_v15, %v680_v4 }
 0x106   :  { %v1709_v11 = vpop.f32.mrf.mxu0  ;;  %v1757_v12 = vpop.f32.mrf.mxu1  ;;  %v402_v38 = vmax.f32 %v330_v20, 0.0  ;;  %v761_v39 = vmax.f32 %v689_v21, 0.0 }
 0x107   :  { %v429_v16 = vadd.f32 %v428_v7, %v398_v5  ;;  %v788_v17 = vadd.f32 %v787_v8, %v757_v6  ;;  %v400_v24 = vmax.f32 %v322_v9, 0.0  ;;  %v759_v26 = vmax.f32 %v681_v10, 0.0 }
 0x108   :  { %v324_v18 = vpop.f32.mrf.mxu0  ;;  %v683_v19 = vpop.f32.mrf.mxu1  ;;  %v333_v34 = vadd.f32 %v1709_v11, %v2171_v15  ;;  %v692_v35 = vadd.f32 %v1757_v12, %v2171_v15 }
 0x109   :  { %v325_v22 = vadd.f32 %v2171_v15, %v324_v18  ;;  %v684_v23 = vadd.f32 %v2171_v15, %v683_v19  ;;  %v430_v25 = vadd.f32 %v429_v16, %v399_v13  ;;  %v789_v27 = vadd.f32 %v788_v17, %v758_v14 }
 0x10a   :  { %v1712_v28 = vpop.f32.mrf.mxu0  ;;  %v1760_v29 = vpop.f32.mrf.mxu1  ;;  %v403_v46 = vmax.f32 %v333_v34, 0.0  ;;  %v762_v47 = vmax.f32 %v692_v35, 0.0 }
 0x10b   :  { %v401_v30 = vmax.f32 %v325_v22, 0.0  ;;  %v760_v31 = vmax.f32 %v684_v23, 0.0  ;;  %v431_v32 = vadd.f32 %v430_v25, %v400_v24  ;;  %v790_v33 = vadd.f32 %v789_v27, %v759_v26 }
 0x10c   :  { %v337_v36 = vpop.f32.mrf.mxu0  ;;  %v696_v37 = vpop.f32.mrf.mxu1  ;;  %v346_v52 = vadd.f32 %v1712_v28, %v2171_v15  ;;  %v705_v53 = vadd.f32 %v1760_v29, %v2171_v15 }
 0x10d   :  { %v432_v40 = vadd.f32 %v431_v32, %v401_v30  ;;  %v791_v41 = vadd.f32 %v790_v33, %v760_v31  ;;  %v338_v42 = vadd.f32 %v2171_v15, %v337_v36  ;;  %v697_v43 = vadd.f32 %v2171_v15, %v696_v37 }
 0x10e   :  { %v1713_v44 = vpop.f32.mrf.mxu0  ;;  %v1761_v45 = vpop.f32.mrf.mxu1  ;;  %v406_v6 = vmax.f32 %v346_v52, 0.0  ;;  %v765_v7 = vmax.f32 %v705_v53, 0.0 }
 0x10f   :  { %v433_v48 = vadd.f32 %v432_v40, %v402_v38  ;;  %v792_v49 = vadd.f32 %v791_v41, %v761_v39  ;;  %v404_v56 = vmax.f32 %v338_v42, 0.0  ;;  %v763_v58 = vmax.f32 %v697_v43, 0.0 }
 0x110   :  { %v340_v50 = vpop.f32.mrf.mxu0  ;;  %v699_v51 = vpop.f32.mrf.mxu1  ;;  %v349_v2 = vadd.f32 %v1713_v44, %v2171_v15  ;;  %v708_v3 = vadd.f32 %v1761_v45, %v2171_v15 }
 0x111   :  { %v341_v54 = vadd.f32 %v2171_v15, %v340_v50  ;;  %v700_v55 = vadd.f32 %v2171_v15, %v699_v51  ;;  %v434_v57 = vadd.f32 %v433_v48, %v403_v46  ;;  %v793_v59 = vadd.f32 %v792_v49, %v762_v47 }
 0x112   :  { %v1716_v60 = vpop.f32.mrf.mxu0  ;;  %v1764_v61 = vpop.f32.mrf.mxu1  ;;  %v407_v14 = vmax.f32 %v349_v2, 0.0  ;;  %v766_v16 = vmax.f32 %v708_v3, 0.0 }
 0x113   :  { %v405_v62 = vmax.f32 %v341_v54, 0.0  ;;  %v764_v63 = vmax.f32 %v700_v55, 0.0  ;;  %v435_v0 = vadd.f32 %v434_v57, %v404_v56  ;;  %v794_v1 = vadd.f32 %v793_v59, %v763_v58 }
 0x114   :  { %v353_v4 = vpop.f32.mrf.mxu0  ;;  %v712_v5 = vpop.f32.mrf.mxu1  ;;  %v362_v21 = vadd.f32 %v1716_v60, %v2171_v15  ;;  %v721_v22 = vadd.f32 %v1764_v61, %v2171_v15 }
 0x115   :  { %v436_v8 = vadd.f32 %v435_v0, %v405_v62  ;;  %v795_v9 = vadd.f32 %v794_v1, %v764_v63  ;;  %v354_v10 = vadd.f32 %v2171_v15, %v353_v4  ;;  %v713_v11 = vadd.f32 %v2171_v15, %v712_v5 }
 0x116   :  { %v1717_v12 = vpop.f32.mrf.mxu0  ;;  %v1765_v13 = vpop.f32.mrf.mxu1  ;;  %v410_v39 = vmax.f32 %v362_v21, 0.0  ;;  %v769_v40 = vmax.f32 %v721_v22, 0.0 }
 0x117   :  { %v437_v17 = vadd.f32 %v436_v8, %v406_v6  ;;  %v796_v18 = vadd.f32 %v795_v9, %v765_v7  ;;  %v408_v25 = vmax.f32 %v354_v10, 0.0  ;;  %v767_v27 = vmax.f32 %v713_v11, 0.0 }
 0x118   :  { %v356_v19 = vpop.f32.mrf.mxu0  ;;  %v715_v20 = vpop.f32.mrf.mxu1  ;;  %v365_v35 = vadd.f32 %v1717_v12, %v2171_v15  ;;  %v724_v36 = vadd.f32 %v1765_v13, %v2171_v15 }
 0x119   :  { %v357_v23 = vadd.f32 %v2171_v15, %v356_v19  ;;  %v716_v24 = vadd.f32 %v2171_v15, %v715_v20  ;;  %v438_v26 = vadd.f32 %v437_v17, %v407_v14  ;;  %v797_v28 = vadd.f32 %v796_v18, %v766_v16 }
 0x11a   :  { %v1720_v29 = vpop.f32.mrf.mxu0  ;;  %v1768_v30 = vpop.f32.mrf.mxu1  ;;  %v411_v47 = vmax.f32 %v365_v35, 0.0  ;;  %v770_v48 = vmax.f32 %v724_v36, 0.0  ;;  %v1868_v35 = vld [vmem:[%s2340_s4 + $0x68] sm:$0xff]  }
 0x11b   :  { %v409_v31 = vmax.f32 %v357_v23, 0.0  ;;  %v768_v32 = vmax.f32 %v716_v24, 0.0  ;;  %v439_v33 = vadd.f32 %v438_v26, %v408_v25  ;;  %v798_v34 = vadd.f32 %v797_v28, %v767_v27  ;;  %v1862_v28 = vld [vmem:[%s2340_s4 + $0x38] sm:$0xff]   ;;  %v1869_v36 = vld [vmem:[%s2340_s4 + $0xe8] sm:$0xff]  }
 0x11c   :  { %v369_v37 = vpop.f32.mrf.mxu0  ;;  %v728_v38 = vpop.f32.mrf.mxu1  ;;  %v378_v53 = vadd.f32 %v1720_v29, %v2171_v15  ;;  %v737_v54 = vadd.f32 %v1768_v30, %v2171_v15  ;;  %v1863_v29 = vld [vmem:[%s2340_s4 + $0xb8] sm:$0xff]  }
 0x11d   :  { %v440_v41 = vadd.f32 %v439_v33, %v409_v31  ;;  %v799_v42 = vadd.f32 %v798_v34, %v768_v32  ;;  %v370_v43 = vadd.f32 %v2171_v15, %v369_v37  ;;  %v729_v44 = vadd.f32 %v2171_v15, %v728_v38  ;;  %v1864_v31 = vld [vmem:[%s2340_s4 + $0x70] sm:$0xff]   ;;  %v1870_v37 = vld [vmem:[%s2340_s4 + $0x28] sm:$0xff]  }
 0x11e   :  { %v1721_v45 = vpop.f32.mrf.mxu0  ;;  %v1769_v46 = vpop.f32.mrf.mxu1  ;;  %v414_v3 = vmax.f32 %v378_v53, 0.0  ;;  %v773_v4 = vmax.f32 %v737_v54, 0.0  ;;  %v1865_v32 = vld [vmem:[%s2340_s4 + $0xf0] sm:$0xff]   ;;  %v1871_v38 = vld [vmem:[%s2340_s4 + $0xa8] sm:$0xff]  }
 0x11f   :  { %v441_v49 = vadd.f32 %v440_v41, %v410_v39  ;;  %v800_v50 = vadd.f32 %v799_v42, %v769_v40  ;;  %v412_v57 = vmax.f32 %v370_v43, 0.0  ;;  %v771_v59 = vmax.f32 %v729_v44, 0.0  ;;  %v1866_v33 = vld [vmem:[%s2340_s4 + $0x30] sm:$0xff]   ;;  %v1872_v39 = vld [vmem:[%s2340_s4 + $0x60] sm:$0xff]   ;;  %v1876_v43 = vld [vmem:[%s2340_s4 + $0x58] sm:$0xff]  }
 0x120   :  { %v372_v51 = vpop.f32.mrf.mxu0  ;;  %v731_v52 = vpop.f32.mrf.mxu1  ;;  %v381_v1 = vadd.f32 %v1721_v45, %v2171_v15  ;;  %v740_v2 = vadd.f32 %v1769_v46, %v2171_v15  ;;  %v1867_v34 = vld [vmem:[%s2340_s4 + $0xb0] sm:$0xff]   ;;  %v1873_v40 = vld [vmem:[%s2340_s4 + $0xe0] sm:$0xff]   ;;  %v1877_v44 = vld [vmem:[%s2340_s4 + $0xd8] sm:$0xff]  }
 0x121   :  { %v373_v55 = vadd.f32 %v2171_v15, %v372_v51  ;;  %v732_v56 = vadd.f32 %v2171_v15, %v731_v52  ;;  %v442_v58 = vadd.f32 %v441_v49, %v411_v47  ;;  %v801_v60 = vadd.f32 %v800_v50, %v770_v48  ;;  %v1874_v41 = vld [vmem:[%s2340_s4 + $0x20] sm:$0xff]   ;;  %v1878_v45 = vld [vmem:[%s2340_s4 + $0x18] sm:$0xff]   ;;  %v1880_v47 = vld [vmem:[%s2340_s4 + $0x50] sm:$0xff]  }
 0x122   :  { %v415_v7 = vmax.f32 %v381_v1, 0.0  ;;  %v774_v8 = vmax.f32 %v740_v2, 0.0  ;;  %v1875_v42 = vld [vmem:[%s2340_s4 + $0xa0] sm:$0xff]   ;;  %v1879_v46 = vld [vmem:[%s2340_s4 + $0x98] sm:$0xff]   ;;  %v1881_v48 = vld [vmem:[%s2340_s4 + $0xd0] sm:$0xff]  }
 0x123   :  { %v413_v61 = vmax.f32 %v373_v55, 0.0  ;;  %v772_v62 = vmax.f32 %v732_v56, 0.0  ;;  %v443_v63 = vadd.f32 %v442_v58, %v412_v57  ;;  %v802_v0 = vadd.f32 %v801_v60, %v771_v59  ;;  %v1882_v49 = vld [vmem:[%s2340_s4 + $0x10] sm:$0xff]   ;;  %v1884_v51 = vld [vmem:[%s2340_s4 + $0x48] sm:$0xff]   ;;  %v1888_v55 = vld [vmem:[%s2340_s4 + $0x40] sm:$0xff]  }
 0x124   :  { %v1883_v50 = vld [vmem:[%s2340_s4 + $0x90] sm:$0xff]   ;;  %v1885_v52 = vld [vmem:[%s2340_s4 + $0xc8] sm:$0xff]   ;;  %v1889_v56 = vld [vmem:[%s2340_s4 + $0xc0] sm:$0xff]   ;;  %v849_v59 = vlaneseq }
 0x125   :  { %v444_v5 = vadd.f32 %v443_v63, %v413_v61  ;;  %v803_v6 = vadd.f32 %v802_v0, %v772_v62  ;;  %v1886_v53 = vld [vmem:[%s2340_s4 + $0x8] sm:$0xff]   ;;  %v1890_v57 = vld [vmem:[%s2340_s4] sm:$0xff]  }
 0x126   :  { %v1887_v54 = vld [vmem:[%s2340_s4 + $0x88] sm:$0xff]   ;;  %v1891_v58 = vld [vmem:[%s2340_s4 + $0x80] sm:$0xff]   ;;  %v850_v60 = vshrl.u32 %v849_v59, 7 }
 0x127   :  { %v445_v9 = vadd.f32 %v444_v5, %v414_v3  ;;  %v804_v10 = vadd.f32 %v803_v6, %v773_v4  ;;  %v23_v63 = vld [vmem:[%s2338_s2 + $0x1] sm:$0xf] }
 0x128   :  { %v851_v61 = vsub.s32 0, %v850_v60  ;;  %v859_v62 = vsub.s32 2, %v850_v60  ;;  %v855_v0 = vsub.s32 1, %v850_v60  ;;  %v863_v1 = vsub.s32 3, %v850_v60 }
 0x129   :  { %v446_v11 = vadd.f32 %v445_v9, %v415_v7  ;;  %v805_v12 = vadd.f32 %v804_v10, %v774_v8 }
 0x12a   :  { %v852_v2 = vrot.slane %v23_v63, %v851_v61  ;;  %v860_v3 = vrot.slane %v23_v63, %v859_v62  ;;  %v856_v4 = vrot.slane %v23_v63, %v855_v0  ;;  %v864_v5 = vrot.slane %v23_v63, %v863_v1 }
 0x12b   :  { %v447_v13 = vrot.slane %v446_v11, 4  ;;  %v806_v14 = vrot.slane %v805_v12, 4 }
 0x12d   :  { %v448_v16 = vadd.f32 %v447_v13, %v446_v11  ;;  %v807_v17 = vadd.f32 %v806_v14, %v805_v12 }
 0x12f   :  { %v449_v18 = vrot.slane %v448_v16, 2  ;;  %v808_v19 = vrot.slane %v807_v17, 2 }
 0x131   :  { %v450_v20 = vadd.f32 %v449_v18, %v448_v16  ;;  %v809_v21 = vadd.f32 %v808_v19, %v807_v17 }
 0x133   :  { %v451_v22 = vrot.slane %v450_v20, 1  ;;  %v810_v15 = vrot.slane %v809_v21, 1 }
 0x135   :  { %v452_v23 = vadd.f32 %v451_v22, %v450_v20  ;;  %v811_v24 = vadd.f32 %v810_v15, %v809_v21 }
 0x137   :  { %v453_v25 = vmul.f32 0.00390625, %v452_v23  ;;  %v812_v26 = vmul.f32 0.00390625, %v811_v24 }
 0x139   :  { %v814_v27 = vsel %vm813_vm0, %v453_v25, %v812_v26 }
 0x13a   :  { %v815_v30 = vpack.c.bf16 %v814_v27, %v814_v27 }
 0x13c   :  { %1062 = vmatmul.mubr.bf16.vlgmr.msra.gmra.mxu0 %v815_v30  ;;  %1103 = vmatmul.mubr.bf16.vlgmr.msra.gmra.mxu1 %v815_v30 }
 0x13d   :  { %1631 = vmatpush3.bf16.msra.mxu0 %v1862_v28  ;;  %1653 = vmatpush3.bf16.msra.mxu1 %v1863_v29  ;;  %v1549_v28 = vld [vmem:[%s2338_s2 + $0x5] ss:$0 sm:$0xff] }
 0x13e   :  { %1632 = vmatprep.subr.bf16.mxu0 %v1864_v31  ;;  %1654 = vmatprep.subr.bf16.mxu1 %v1865_v32 }
 0x141   :  { %1633 = vmatpush3.bf16.msra.mxu0 %v1866_v33  ;;  %1655 = vmatpush3.bf16.msra.mxu1 %v1867_v34 }
 0x142   :  { %1634 = vmatprep.subr.bf16.mxu0 %v1868_v35  ;;  %1656 = vmatprep.subr.bf16.mxu1 %v1869_v36 }
 0x145   :  { %1635 = vmatpush3.bf16.msra.mxu0 %v1870_v37  ;;  %1657 = vmatpush3.bf16.msra.mxu1 %v1871_v38 }
 0x146   :  { %1636 = vmatprep.subr.bf16.mxu0 %v1872_v39  ;;  %1658 = vmatprep.subr.bf16.mxu1 %v1873_v40 }
 0x149   :  { %1637 = vmatpush3.bf16.msra.mxu0 %v1874_v41  ;;  %1659 = vmatpush3.bf16.msra.mxu1 %v1875_v42 }
 0x14a   :  { %1638 = vmatprep.subr.bf16.mxu0 %v1876_v43  ;;  %1660 = vmatprep.subr.bf16.mxu1 %v1877_v44 }
 0x14d   :  { %1639 = vmatpush3.bf16.msra.mxu0 %v1878_v45  ;;  %1661 = vmatpush3.bf16.msra.mxu1 %v1879_v46 }
 0x14e   :  { %1640 = vmatprep.subr.bf16.mxu0 %v1880_v47  ;;  %1662 = vmatprep.subr.bf16.mxu1 %v1881_v48 }
 0x151   :  { %1641 = vmatpush3.bf16.msra.mxu0 %v1882_v49  ;;  %1663 = vmatpush3.bf16.msra.mxu1 %v1883_v50 }
 0x152   :  { %1642 = vmatprep.subr.bf16.mxu0 %v1884_v51  ;;  %1664 = vmatprep.subr.bf16.mxu1 %v1885_v52 }
 0x155   :  { %1643 = vmatpush3.bf16.msra.mxu0 %v1886_v53  ;;  %1665 = vmatpush3.bf16.msra.mxu1 %v1887_v54 }
 0x156   :  { %1644 = vmatprep.subr.bf16.mxu0 %v1888_v55  ;;  %1666 = vmatprep.subr.bf16.mxu1 %v1889_v56 }
 0x159   :  { %1645 = vmatpush3.bf16.msra.mxu0 %v1890_v57  ;;  %1667 = vmatpush3.bf16.msra.mxu1 %v1891_v58 }
 0x1fc   :  { %v1063_v6 = vpop.f32.mrf.mxu0  ;;  %v1104_v7 = vpop.f32.mrf.mxu1 }
 0x1fd   :  { %v1064_v8 = vadd.f32 %v1063_v6, %v852_v2  ;;  %v1105_v9 = vadd.f32 %v1104_v7, %v860_v3 }
 0x1fe   :  { %v1065_v10 = vpop.f32.mrf.mxu0  ;;  %v1106_v11 = vpop.f32.mrf.mxu1 }
 0x1ff   :  { %v1066_v12 = vadd.f32 %v1065_v10, %v856_v4  ;;  %v1107_v13 = vadd.f32 %v1106_v11, %v864_v5  ;;  %v1111_v14 = vmax.f32 %v1064_v8, 0.0  ;;  %v1113_v16 = vmax.f32 %v1105_v9, 0.0 }
 0x200   :  { %v1067_v17 = vpop.f32.mrf.mxu0  ;;  %v1108_v18 = vpop.f32.mrf.mxu1 }
 0x201   :  { %v1112_v19 = vmax.f32 %v1066_v12, 0.0  ;;  %v1114_v20 = vmax.f32 %v1107_v13, 0.0  ;;  %v1115_v24 = vpack.c.bf16 %v1111_v14, %v1111_v14  ;;  %v1117_v25 = vpack.c.bf16 %v1113_v16, %v1113_v16 }
 0x202   :  { %v1068_v21 = vpop.f32.mrf.mxu0  ;;  %v1109_v22 = vpop.f32.mrf.mxu1 }
 0x203   :  { %v1116_v15 = vpack.c.bf16 %v1112_v19, %v1112_v19  ;;  %v1118_v23 = vpack.c.bf16 %v1114_v20, %v1114_v20 }
 0x205   :  { %1413 = vmatprep.mubr.bf16.mxu0 %v1116_v15  ;;  %1453 = vmatprep.mubr.bf16.mxu1 %v1118_v23 }
 0x206   :  { %1414 = vmatmul.mubr.bf16.vlgmr.msra.gmra.mxu0 %v1115_v24  ;;  %1454 = vmatmul.mubr.bf16.vlgmr.msra.gmra.mxu1 %v1117_v25 }
 0x2c6   :  { %v1646_v26 = vpop.f32.mrf.mxu0  ;;  %v1668_v27 = vpop.f32.mrf.mxu1 }
 0x2c8   :  { %v1647_v29 = vpop.f32.mrf.mxu0  ;;  %v1669_v30 = vpop.f32.mrf.mxu1 }
 0x2c9   :  { %v1648_v31 = vadd.f32 %v1647_v29, %v1646_v26  ;;  %v1670_v35 = vadd.f32 %v1669_v30, %v1668_v27 }
 0x2ca   :  { %v1649_v32 = vpop.f32.mrf.mxu0  ;;  %v1671_v33 = vpop.f32.mrf.mxu1 }
 0x2cb   :  { %v1416_v34 = vadd.f32 %v1648_v31, %v1549_v28 }
 0x2cc   :  { %v1650_v36 = vpop.f32.mrf.mxu0  ;;  %v1672_v37 = vpop.f32.mrf.mxu1 }
 0x2cd   :  { %v1456_v38 = vadd.f32 %v1670_v35, %v1416_v34 }
 0x2cf   :  { %1461 = vst [vmem:[#allocation2] sm:$0x3] %v1456_v38 }
 0x2d0   :  { %1903 = shalt.err (!%p1900_p4)
}
 0x2d1   :  { %1471 = dma.vmem_to_hbm [thread:$0]  %s1469_s17, 32, %s2341_s5, [#allocation3]  }
 0x2d2   :  { %1912 = dma.done.wait [#allocation3], 32  }
 0x2d3   :  { %1913 = vsyncadd [#allocation3], 4294967264 }
 0x2d4   :  { %1475 = vsyncpa [#allocation3], 1 }

</bundles_post_ra>
